<compile_context>
chip_gen: v5e
topology: v5e:2x2
jax: 0.10.0
libtpu: 0.0.40
codegen_flags: <defaults>
</compile_context>

<pallas_src>
import functools

import jax
import jax.numpy as jnp
from jax.experimental import pallas as pl
from jax.experimental.pallas import tpu as pltpu


def _round_up(x, m):
    return ((x + m - 1) // m) * m


def _critic_kernel(x_ref, a_ref,
                   w1s_ref, w1a_ref, b1_ref,
                   w2_ref, b2_ref,
                   w3_ref, b3_ref,
                   w4_ref, b4_ref,
                   out_ref):
    """Fused 4-layer MLP over one batch tile.

    All matmuls hit the MXU with bf16 inputs and f32 accumulation; bias-add and
    relu run on the VPU.  Weights are (in_features, out_features), so the
    kernel computes x @ W + b == PyTorch's x @ W_torch.T + b.
    """
    # fc1 with the concat folded in: cat([x, a]) @ w1 == x @ w1_s + a @ w1_a.
    h = (jnp.dot(x_ref[...], w1s_ref[...], preferred_element_type=jnp.float32)
         + jnp.dot(a_ref[...], w1a_ref[...], preferred_element_type=jnp.float32)
         + b1_ref[...])
    h = jnp.maximum(h, 0.0)

    h = jnp.dot(h.astype(jnp.bfloat16), w2_ref[...],
                preferred_element_type=jnp.float32) + b2_ref[...]
    h = jnp.maximum(h, 0.0)

    h = jnp.dot(h.astype(jnp.bfloat16), w3_ref[...],
                preferred_element_type=jnp.float32) + b3_ref[...]
    h = jnp.maximum(h, 0.0)

    h = jnp.dot(h.astype(jnp.bfloat16), w4_ref[...],
                preferred_element_type=jnp.float32) + b4_ref[...]
    out_ref[...] = h.astype(out_ref.dtype)


@functools.partial(jax.jit, static_argnames=("tile_m",))
def critic_forward(x, a, params, *, tile_m=256):
    """Pallas-backed equivalent of Critic.forward(x, a)."""
    B, state_dim = x.shape
    action_dim = a.shape[1]

    (w1s, w1a, b1), (w2, b2), (w3, b3), (w4, b4) = params

    # Batch tile: multiple of 8 sublanes, capped at tile_m; pad B to a multiple.
    tm = min(tile_m, _round_up(B, 8))
    Bp = _round_up(B, tm)

    xb = x.astype(jnp.bfloat16)
    ab = a.astype(jnp.bfloat16)
    if Bp != B:
        xb = jnp.pad(xb, ((0, Bp - B), (0, 0)))
        ab = jnp.pad(ab, ((0, Bp - B), (0, 0)))

    vmem = pltpu.MemorySpace.VMEM

    def batch_spec(feat):
        return pl.BlockSpec((tm, feat), lambda i: (i, 0), memory_space=vmem)

    def param_spec(shape):
        # Same (0, 0) block every grid step -> parameters stay VMEM-resident.
        return pl.BlockSpec(shape, lambda i: (0, 0), memory_space=vmem)

    in_specs = [
        batch_spec(state_dim),
        batch_spec(action_dim),
        param_spec(w1s.shape), param_spec(w1a.shape), param_spec(b1.shape),
        param_spec(w2.shape), param_spec(b2.shape),
        param_spec(w3.shape), param_spec(b3.shape),
        param_spec(w4.shape), param_spec(b4.shape),
    ]

    out = pl.pallas_call(
        _critic_kernel,
        out_shape=jax.ShapeDtypeStruct((Bp, 1), jnp.float32),
        grid=(Bp // tm,),
        in_specs=in_specs,
        out_specs=pl.BlockSpec((tm, 1), lambda i: (i, 0), memory_space=vmem),
        compiler_params=pltpu.CompilerParams(
            dimension_semantics=("parallel",)),  # megacore sharding on v7x
    )(xb, ab, w1s, w1a, b1, w2, b2, w3, b3, w4, b4)

    return out[:B]


def init_critic_params(key, state_dim, action_dim, hidden_dim=64):
    """nn.Linear-default init: U(-1/sqrt(fan_in), +1/sqrt(fan_in)).

    Weights are stored transposed relative to PyTorch (shape (in, out)) and in
    bf16 (MXU-native); biases stay f32.  fc1's weight is split into the state
    rows and the action rows so the kernel can fold the concat in.
    """
    dims = [
        (state_dim + action_dim, hidden_dim),   # fc1
        (hidden_dim, hidden_dim * 2),           # fc2
        (hidden_dim * 2, hidden_dim),           # fc3
        (hidden_dim, 1),                        # fc4
    ]
    raw = []
    for (fan_in, fan_out) in dims:
        key, kw, kb = jax.random.split(key, 3)
        bound = 1.0 / jnp.sqrt(jnp.float32(fan_in))
        w = jax.random.uniform(kw, (fan_in, fan_out), jnp.float32, -bound, bound)
        b = jax.random.uniform(kb, (1, fan_out), jnp.float32, -bound, bound)
        raw.append((w, b))

    (w1, b1), (w2, b2), (w3, b3), (w4, b4) = raw
    w1s = w1[:state_dim].astype(jnp.bfloat16)
    w1a = w1[state_dim:].astype(jnp.bfloat16)
    return (
        (w1s, w1a, b1),
        (w2.astype(jnp.bfloat16), b2),
        (w3.astype(jnp.bfloat16), b3),
        (w4.astype(jnp.bfloat16), b4),
    )


def critic_ref(x, a, params):
    """Pure-JAX reference (f32 math on the same bf16-stored weights)."""
    (w1s, w1a, b1), (w2, b2), (w3, b3), (w4, b4) = params
    xb = x.astype(jnp.bfloat16).astype(jnp.float32)
    ab = a.astype(jnp.bfloat16).astype(jnp.float32)
    h = jnp.concatenate([xb, ab], axis=1)
    w1 = jnp.concatenate([w1s, w1a], axis=0).astype(jnp.float32)
    h = jax.nn.relu(h @ w1 + b1)
    h = jax.nn.relu(h @ w2.astype(jnp.float32) + b2)
    h = jax.nn.relu(h @ w3.astype(jnp.float32) + b3)
    return h @ w4.astype(jnp.float32) + b4


if __name__ == "__main__":
    key = jax.random.PRNGKey(0)
    k_params, k_x, k_a, k_x2, k_a2 = jax.random.split(key, 5)

    state_dim, action_dim, hidden_dim = 12, 4, 64
    params = init_critic_params(k_params, state_dim, action_dim, hidden_dim)

    # Small batch (single grid step).
    batch = 8
    x = jax.random.normal(k_x, (batch, state_dim), jnp.float32)
    a = jax.random.normal(k_a, (batch, action_dim), jnp.float32)
    q = jax.block_until_ready(critic_forward(x, a, params))
    q_ref = jax.block_until_ready(critic_ref(x, a, params))
    assert q.shape == (batch, 1)
    assert jnp.allclose(q, q_ref, atol=2e-2, rtol=2e-2), "mismatch (small batch)"

    # Larger, non-multiple batch: exercises grid > 1, padding + slice-back.
    batch2 = 40
    x2 = jax.random.normal(k_x2, (batch2, state_dim), jnp.float32)
    a2 = jax.random.normal(k_a2, (batch2, action_dim), jnp.float32)
    q2 = jax.block_until_ready(critic_forward(x2, a2, params, tile_m=16))
    q2_ref = jax.block_until_ready(critic_ref(x2, a2, params))
    assert q2.shape == (batch2, 1)
    assert jnp.allclose(q2, q2_ref, atol=2e-2, rtol=2e-2), "mismatch (gridded batch)"

    print("KERNEL_OK")
</pallas_src>

<mosaic_0001>
module attributes {stable_mosaic.version = 11 : i64} {
  func.func @_critic_kernel(%arg0: i32, %arg1: memref<8x12xbf16, #tpu.memory_space<vmem>>, %arg2: memref<8x4xbf16, #tpu.memory_space<vmem>>, %arg3: memref<12x64xbf16, #tpu.memory_space<vmem>>, %arg4: memref<4x64xbf16, #tpu.memory_space<vmem>>, %arg5: memref<1x64xf32, #tpu.memory_space<vmem>>, %arg6: memref<64x128xbf16, #tpu.memory_space<vmem>>, %arg7: memref<1x128xf32, #tpu.memory_space<vmem>>, %arg8: memref<128x64xbf16, #tpu.memory_space<vmem>>, %arg9: memref<1x64xf32, #tpu.memory_space<vmem>>, %arg10: memref<64x1xbf16, #tpu.memory_space<vmem>>, %arg11: memref<1x1xf32, #tpu.memory_space<vmem>>, %arg12: memref<8x1xf32, #tpu.memory_space<vmem>>) attributes {dimension_semantics = [#tpu.dimension_semantics<parallel>], iteration_bounds = array<i64: 1>, scalar_prefetch = 0 : i64, scratch_operands = 0 : i64, tpu.core_type = #tpu.core_type<tc>, window_params = [{transform_indices = @transform_0, window_bounds = array<i64: 8, 12>}, {transform_indices = @transform_1, window_bounds = array<i64: 8, 4>}, {pipeline_mode = #tpu.pipeline_mode<synchronous>, transform_indices = @transform_2, window_bounds = array<i64: 12, 64>}, {pipeline_mode = #tpu.pipeline_mode<synchronous>, transform_indices = @transform_3, window_bounds = array<i64: 4, 64>}, {pipeline_mode = #tpu.pipeline_mode<synchronous>, transform_indices = @transform_4, window_bounds = array<i64: 1, 64>}, {pipeline_mode = #tpu.pipeline_mode<synchronous>, transform_indices = @transform_5, window_bounds = array<i64: 64, 128>}, {pipeline_mode = #tpu.pipeline_mode<synchronous>, transform_indices = @transform_6, window_bounds = array<i64: 1, 128>}, {pipeline_mode = #tpu.pipeline_mode<synchronous>, transform_indices = @transform_7, window_bounds = array<i64: 128, 64>}, {pipeline_mode = #tpu.pipeline_mode<synchronous>, transform_indices = @transform_8, window_bounds = array<i64: 1, 64>}, {pipeline_mode = #tpu.pipeline_mode<synchronous>, transform_indices = @transform_9, window_bounds = array<i64: 64, 1>}, {pipeline_mode = #tpu.pipeline_mode<synchronous>, transform_indices = @transform_10, window_bounds = array<i64: 1, 1>}, {transform_indices = @transform_11, window_bounds = array<i64: 8, 1>}]} {
    %c0 = arith.constant 0 : index
    %c0_0 = arith.constant 0 : index
    %0 = vector.load %arg1[%c0, %c0_0] : memref<8x12xbf16, #tpu.memory_space<vmem>>, vector<8x12xbf16>
    %c0_1 = arith.constant 0 : index
    %c0_2 = arith.constant 0 : index
    %1 = vector.load %arg3[%c0_1, %c0_2] : memref<12x64xbf16, #tpu.memory_space<vmem>>, vector<12x64xbf16>
    %cst = arith.constant dense<0.000000e+00> : vector<8x64xf32>
    %2 = tpu.matmul %0, %1, %cst {dimension_numbers = #tpu.dot_dimension_numbers<[1], [0], [0], [1], [0, 0, 1, 1], [], []>} : vector<8x12xbf16>, vector<12x64xbf16>, vector<8x64xf32> -> vector<8x64xf32>
    %c0_3 = arith.constant 0 : index
    %c0_4 = arith.constant 0 : index
    %3 = vector.load %arg2[%c0_3, %c0_4] : memref<8x4xbf16, #tpu.memory_space<vmem>>, vector<8x4xbf16>
    %c0_5 = arith.constant 0 : index
    %c0_6 = arith.constant 0 : index
    %4 = vector.load %arg4[%c0_5, %c0_6] : memref<4x64xbf16, #tpu.memory_space<vmem>>, vector<4x64xbf16>
    %cst_7 = arith.constant dense<0.000000e+00> : vector<8x64xf32>
    %5 = tpu.matmul %3, %4, %cst_7 {dimension_numbers = #tpu.dot_dimension_numbers<[1], [0], [0], [1], [0, 0, 1, 1], [], []>} : vector<8x4xbf16>, vector<4x64xbf16>, vector<8x64xf32> -> vector<8x64xf32>
    %6 = arith.addf %2, %5 : vector<8x64xf32>
    %c0_8 = arith.constant 0 : index
    %c0_9 = arith.constant 0 : index
    %7 = vector.load %arg5[%c0_8, %c0_9] : memref<1x64xf32, #tpu.memory_space<vmem>>, vector<1x64xf32>
    %8 = vector.broadcast %7 : vector<1x64xf32> to vector<8x64xf32>
    %9 = arith.addf %6, %8 : vector<8x64xf32>
    %cst_10 = arith.constant 0.000000e+00 : f32
    %10 = vector.broadcast %cst_10 : f32 to vector<8x64xf32>
    %11 = arith.maximumf %9, %10 : vector<8x64xf32>
    %12 = arith.truncf %11 : vector<8x64xf32> to vector<8x64xbf16>
    %c0_11 = arith.constant 0 : index
    %c0_12 = arith.constant 0 : index
    %13 = vector.load %arg6[%c0_11, %c0_12] : memref<64x128xbf16, #tpu.memory_space<vmem>>, vector<64x128xbf16>
    %cst_13 = arith.constant dense<0.000000e+00> : vector<8x128xf32>
    %14 = tpu.matmul %12, %13, %cst_13 {dimension_numbers = #tpu.dot_dimension_numbers<[1], [0], [0], [1], [0, 0, 1, 1], [], []>} : vector<8x64xbf16>, vector<64x128xbf16>, vector<8x128xf32> -> vector<8x128xf32>
    %c0_14 = arith.constant 0 : index
    %c0_15 = arith.constant 0 : index
    %15 = vector.load %arg7[%c0_14, %c0_15] : memref<1x128xf32, #tpu.memory_space<vmem>>, vector<1x128xf32>
    %16 = vector.broadcast %15 : vector<1x128xf32> to vector<8x128xf32>
    %17 = arith.addf %14, %16 : vector<8x128xf32>
    %cst_16 = arith.constant 0.000000e+00 : f32
    %18 = vector.broadcast %cst_16 : f32 to vector<8x128xf32>
    %19 = arith.maximumf %17, %18 : vector<8x128xf32>
    %20 = arith.truncf %19 : vector<8x128xf32> to vector<8x128xbf16>
    %c0_17 = arith.constant 0 : index
    %c0_18 = arith.constant 0 : index
    %21 = vector.load %arg8[%c0_17, %c0_18] : memref<128x64xbf16, #tpu.memory_space<vmem>>, vector<128x64xbf16>
    %cst_19 = arith.constant dense<0.000000e+00> : vector<8x64xf32>
    %22 = tpu.matmul %20, %21, %cst_19 {dimension_numbers = #tpu.dot_dimension_numbers<[1], [0], [0], [1], [0, 0, 1, 1], [], []>} : vector<8x128xbf16>, vector<128x64xbf16>, vector<8x64xf32> -> vector<8x64xf32>
    %c0_20 = arith.constant 0 : index
    %c0_21 = arith.constant 0 : index
    %23 = vector.load %arg9[%c0_20, %c0_21] : memref<1x64xf32, #tpu.memory_space<vmem>>, vector<1x64xf32>
    %24 = vector.broadcast %23 : vector<1x64xf32> to vector<8x64xf32>
    %25 = arith.addf %22, %24 : vector<8x64xf32>
    %cst_22 = arith.constant 0.000000e+00 : f32
    %26 = vector.broadcast %cst_22 : f32 to vector<8x64xf32>
    %27 = arith.maximumf %25, %26 : vector<8x64xf32>
    %28 = arith.truncf %27 : vector<8x64xf32> to vector<8x64xbf16>
    %c0_23 = arith.constant 0 : index
    %c0_24 = arith.constant 0 : index
    %29 = vector.load %arg10[%c0_23, %c0_24] : memref<64x1xbf16, #tpu.memory_space<vmem>>, vector<64x1xbf16>
    %cst_25 = arith.constant dense<0.000000e+00> : vector<8x1xf32>
    %30 = tpu.matmul %28, %29, %cst_25 {dimension_numbers = #tpu.dot_dimension_numbers<[1], [0], [0], [1], [0, 0, 1, 1], [], []>} : vector<8x64xbf16>, vector<64x1xbf16>, vector<8x1xf32> -> vector<8x1xf32>
    %c0_26 = arith.constant 0 : index
    %c0_27 = arith.constant 0 : index
    %31 = vector.load %arg11[%c0_26, %c0_27] : memref<1x1xf32, #tpu.memory_space<vmem>>, vector<1x1xf32>
    %32 = vector.broadcast %31 : vector<1x1xf32> to vector<8x1xf32>
    %33 = arith.addf %30, %32 : vector<8x1xf32>
    %c0_28 = arith.constant 0 : index
    %c0_29 = arith.constant 0 : index
    %34 = vector.load %arg12[%c0_28, %c0_29] : memref<8x1xf32, #tpu.memory_space<vmem>>, vector<8x1xf32>
    tpu.vector_store %arg12[%c0_28, %c0_29], %33 {strides = array<i32>} : memref<8x1xf32, #tpu.memory_space<vmem>>, vector<8x1xf32>,
    return
  }
  func.func @transform_0(%arg0: i32) -> (i32, i32) {
    %c0_i32 = arith.constant 0 : i32
    %c0_i32_0 = arith.constant 0 : i32
    return %arg0, %c0_i32 : i32, i32
  }
  func.func @transform_1(%arg0: i32) -> (i32, i32) {
    %c0_i32 = arith.constant 0 : i32
    %c0_i32_0 = arith.constant 0 : i32
    return %arg0, %c0_i32 : i32, i32
  }
  func.func @transform_2(%arg0: i32) -> (i32, i32) {
    %c0_i32 = arith.constant 0 : i32
    %c0_i32_0 = arith.constant 0 : i32
    %c0_i32_1 = arith.constant 0 : i32
    return %c0_i32, %c0_i32_0 : i32, i32
  }
  func.func @transform_3(%arg0: i32) -> (i32, i32) {
    %c0_i32 = arith.constant 0 : i32
    %c0_i32_0 = arith.constant 0 : i32
    %c0_i32_1 = arith.constant 0 : i32
    return %c0_i32, %c0_i32_0 : i32, i32
  }
  func.func @transform_4(%arg0: i32) -> (i32, i32) {
    %c0_i32 = arith.constant 0 : i32
    %c0_i32_0 = arith.constant 0 : i32
    %c0_i32_1 = arith.constant 0 : i32
    return %c0_i32, %c0_i32_0 : i32, i32
  }
  func.func @transform_5(%arg0: i32) -> (i32, i32) {
    %c0_i32 = arith.constant 0 : i32
    %c0_i32_0 = arith.constant 0 : i32
    %c0_i32_1 = arith.constant 0 : i32
    return %c0_i32, %c0_i32_0 : i32, i32
  }
  func.func @transform_6(%arg0: i32) -> (i32, i32) {
    %c0_i32 = arith.constant 0 : i32
    %c0_i32_0 = arith.constant 0 : i32
    %c0_i32_1 = arith.constant 0 : i32
    return %c0_i32, %c0_i32_0 : i32, i32
  }
  func.func @transform_7(%arg0: i32) -> (i32, i32) {
    %c0_i32 = arith.constant 0 : i32
    %c0_i32_0 = arith.constant 0 : i32
    %c0_i32_1 = arith.constant 0 : i32
    return %c0_i32, %c0_i32_0 : i32, i32
  }
  func.func @transform_8(%arg0: i32) -> (i32, i32) {
    %c0_i32 = arith.constant 0 : i32
    %c0_i32_0 = arith.constant 0 : i32
    %c0_i32_1 = arith.constant 0 : i32
    return %c0_i32, %c0_i32_0 : i32, i32
  }
  func.func @transform_9(%arg0: i32) -> (i32, i32) {
    %c0_i32 = arith.constant 0 : i32
    %c0_i32_0 = arith.constant 0 : i32
    %c0_i32_1 = arith.constant 0 : i32
    return %c0_i32, %c0_i32_0 : i32, i32
  }
  func.func @transform_10(%arg0: i32) -> (i32, i32) {
    %c0_i32 = arith.constant 0 : i32
    %c0_i32_0 = arith.constant 0 : i32
    %c0_i32_1 = arith.constant 0 : i32
    return %c0_i32, %c0_i32_0 : i32, i32
  }
  func.func @transform_11(%arg0: i32) -> (i32, i32) {
    %c0_i32 = arith.constant 0 : i32
    %c0_i32_0 = arith.constant 0 : i32
    return %arg0, %c0_i32 : i32, i32
  }
}

</mosaic_0001>

<bundles_post_ra>
// kernel: critic_forward.1
= control target key start
LH: loop header
LB: loop body
LE: loop exit
PB: predicated region body
PF: predicated region fallthrough
CT: control target
= control target key end

     0   :  { %vm50_vm0 = vcmask 1041408   ;;  %vm76_vm1 = vcmask 1045504   ;;  %vm46_vm2 = vcmask 31744   ;;  %vm72_vm3 = vcmask 97280   ;;  %s529_s3 = inlined_call_operand.vmem [shape: bf16[4,64], index: 3, kind: input, shape index: {}]   ;;  %s530_s2 = inlined_call_operand.vmem [shape: bf16[12,64], index: 2, kind: input, shape index: {}]   ;;  %s531_s1 = inlined_call_operand.vmem [shape: bf16[8,4], index: 1, kind: input, shape index: {}]   ;;  %s532_s5 = inlined_call_operand.vmem [shape: bf16[64,128], index: 5, kind: input, shape index: {}]   ;;  %s533_s0 = inlined_call_operand.vmem [shape: bf16[8,12], index: 0, kind: input, shape index: {}]   ;;  %s534_s4 = inlined_call_operand.vmem [shape: f32[1,64], index: 4, kind: input, shape index: {}]   ;;  %s535_s6 = inlined_call_operand.vmem [shape: f32[1,128], index: 6, kind: input, shape index: {}]   ;;  %s536_s7 = inlined_call_operand.vmem [shape: bf16[128,64], index: 7, kind: input, shape index: {}]   ;;  %s537_s8 = inlined_call_operand.vmem [shape: f32[1,64], index: 8, kind: input, shape index: {}]   ;;  %s538_s9 = inlined_call_operand.vmem [shape: bf16[64,1], index: 9, kind: input, shape index: {}]   ;;  %s539_s10 = inlined_call_operand.<no memory space> [shape: f32[1,1], index: 10, kind: input, shape index: {}]   ;;  %s540_s11 = inlined_call_operand.vmem [shape: f32[8,1], index: 11, kind: output, shape index: {}]  }
   0x1   :  { %v45_v0 = vld [vmem:[%s529_s3] sm:$0x3]  ;;  %v368_v2 = vld [vmem:[%s530_s2] sm:$0x30]  ;;  %v372_v5 = vld [vmem:[%s532_s5 + $0x18] sm:$0xff]  ;;  %vm136_vm4 = vcmask 523264   ;;  %v16_v39 = vstv %s539_s10 }
   0x2   :  { %v299_v1 = vld [vmem:[%s530_s2] sm:$0xf]  ;;  %v52_v3 = vsel %vm50_vm0, %v45_v0, 0  ;;  %144 = vmatpush.bf16.msra.mxu2 %v372_v5  ;;  %v371_v9 = vld [vmem:[%s532_s5 + $0x10] sm:$0xff]  ;;  %v370_v10 = vld [vmem:[%s532_s5 + $0x8] sm:$0xff]  ;;  %vm290_vm5 = vcmask 7168  }
   0x3   :  { %v300_v4 = vor.u32 %v368_v2, %v299_v1  ;;  %61 = vmatpush.bf16.msra.mxu0 %v52_v3  ;;  %v44_v6 = vld [vmem:[%s531_s1] sm:$0xf]  ;;  %v380_v12 = vld [vmem:[%s536_s7 + $0x38] sm:$0xff]  ;;  %v379_v13 = vld [vmem:[%s536_s7 + $0x30] sm:$0xff]  ;;  %17 = vst [vmem:[#allocation2] sm:$0x1] %v16_v39 }
   0x4   :  { %v41_v8 = vld [vmem:[%s533_s0] sm:$0xf]  ;;  %223 = vmatpush.bf16.msra.mxu3 %v380_v12  ;;  %v378_v14 = vld [vmem:[%s536_s7 + $0x28] sm:$0xff]  ;;  %v376_v16 = vld [vmem:[%s536_s7 + $0x18] sm:$0xff] }
   0x5   :  { %v78_v7 = vsel %vm76_vm1, %v300_v4, 0  ;;  %v369_v11 = vld [vmem:[%s532_s5] sm:$0xff]  ;;  %v375_v17 = vld [vmem:[%s536_s7 + $0x10] sm:$0xff]  ;;  %v374_v27 = vld [vmem:[%s536_s7 + $0x8] sm:$0xff] }
   0x6   :  { %87 = vmatpush.bf16.msra.mxu1 %v78_v7  ;;  %296 = vmatmul.msk.bf16.vlgmr.msra.gmra.mxu0 %vm46_vm2, %v44_v6  ;;  %v377_v15 = vld [vmem:[%s536_s7 + $0x20] sm:$0xff]  ;;  %v384_v29 = vld [vmem:[%s538_s9 + $0x18] sm:$0xff]  ;;  %v383_v30 = vld [vmem:[%s538_s9 + $0x10] sm:$0xff] }
   0x7   :  { %145 = vmatpush.bf16.msra.mxu2 %v371_v9  ;;  %v385_v19 = vld [vmem:[%s534_s4] ss:$0 sm:$0xff]  ;;  %281 = vmatpush.bf16.msrb.mxu0 %v384_v29  ;;  %v382_v31 = vld [vmem:[%s538_s9 + $0x8] sm:$0xff] }
   0x8   :  { %224 = vmatpush.bf16.msra.mxu3 %v379_v13  ;;  %v373_v28 = vld [vmem:[%s536_s7] sm:$0xff] }
   0x9   :  { %301 = vmatmul.msk.bf16.vlgmr.msra.gmra.mxu1 %vm72_vm3, %v41_v8  ;;  %v386_v32 = vld [vmem:[%s535_s6] ss:$0 sm:$0xff] }
   0xa   :  { %v381_v38 = vld [vmem:[%s538_s9] sm:$0xff] }
   0xb   :  { %146 = vmatpush.bf16.msra.mxu2 %v370_v10  ;;  %282 = vmatpush.bf16.msrb.mxu0 %v383_v30  ;;  %v387_v40 = vld [vmem:[%s537_s8] ss:$0 sm:$0xff] }
   0xc   :  { %225 = vmatpush.bf16.msra.mxu3 %v378_v14  ;;  %v388_v46 = vld [vmem:[#allocation2] ss:$0 sm:$0xff] }
   0xf   :  { %147 = vmatpush.bf16.msra.mxu2 %v369_v11  ;;  %283 = vmatpush.bf16.msrb.mxu0 %v382_v31 }
  0x10   :  { %226 = vmatpush.bf16.msra.mxu3 %v377_v15 }
  0x13   :  { %284 = vmatpush.bf16.msrb.mxu0 %v381_v38 }
  0x14   :  { %227 = vmatpush.bf16.msra.mxu3 %v376_v16 }
  0x18   :  { %228 = vmatpush.bf16.msra.mxu3 %v375_v17 }
  0x1c   :  { %229 = vmatpush.bf16.msra.mxu3 %v374_v27 }
  0x20   :  { %230 = vmatpush.bf16.msra.mxu3 %v373_v28 }
  0x83   :  { %v63_v18 = vpop.f32.mrf.mxu0 }
  0x86   :  { %v89_v20 = vpop.f32.mrf.mxu1 }
  0x87   :  { %v90_v21 = vadd.f32 %v89_v20, %v63_v18 }
  0x89   :  { %v97_v22 = vadd.f32 %v385_v19, %v90_v21 }
  0x8b   :  { %v98_v23 = vmax.f32 %v97_v22, 0.0  ;;  %v65_v24 = vpop.f32.mrf.mxu0 }
  0x8d   :  { %v99_v25 = vpack.c.bf16 %v98_v23, %v98_v23 }
  0x8e   :  { %v91_v26 = vpop.f32.mrf.mxu1 }
  0x8f   :  { %318 = vmatmul.msk.bf16.vlgmr.msra.gmra.mxu2 %vm136_vm4, %v99_v25 }
 0x112   :  { %v149_v33 = vpop.f32.mrf.mxu2 }
 0x113   :  { %v150_v34 = vadd.f32 %v386_v32, %v149_v33 }
 0x115   :  { %v153_v35 = vmax.f32 %v150_v34, 0.0 }
 0x117   :  { %v154_v36 = vpack.c.bf16 %v153_v35, %v153_v35 }
 0x119   :  { %231 = vmatmul.bf16.vlgmr.msra.gmra.mxu3 %v154_v36 }
 0x11a   :  { %v151_v37 = vpop.f32.mrf.mxu2 }
 0x19c   :  { %v232_v41 = vpop.f32.mrf.mxu3 }
 0x19d   :  { %v233_v42 = vadd.f32 %v387_v40, %v232_v41 }
 0x19f   :  { %v236_v43 = vmax.f32 %v233_v42, 0.0 }
 0x1a1   :  { %v237_v44 = vpack.c.bf16 %v236_v43, %v236_v43 }
 0x1a3   :  { %367 = vmatmul.msk.bf16.vlgmr.msrb.gmra.mxu0 %vm136_vm4, %v237_v44 }
 0x1a4   :  { %v234_v45 = vpop.f32.mrf.mxu3 }
 0x220   :  { %v286_v47 = vpop.f32.mrf.mxu0 }
 0x221   :  { %v287_v48 = vadd.f32 %v388_v46, %v286_v47 }
 0x223   :  { %291 = vst.msk [vmem:[%s540_s11] sm:$0xff] %vm290_vm5, %v287_v48 }
 0x228   :  { %v288_v49 = vpop.f32.mrf.mxu0 }

</bundles_post_ra>
